<compile_context>
chip_gen: v7x
topology: tpu7x:2x2x1
jax: 0.10.0
libtpu: 0.0.40
codegen_flags: <defaults>
</compile_context>

<pallas_src>
import functools

import jax
import jax.numpy as jnp
import numpy as np
from jax import lax
from jax.experimental import pallas as pl
from jax.experimental.pallas import tpu as pltpu

INPUT_DIM = 14
HIDDEN2 = 4
EPS = 1e-5

# Default batch tile.  x is streamed in its natural (B, 14) layout, so one x
# block occupies tile_b x 128 lanes (the 14-wide minor dim pads to a full
# lane) x itemsize in VMEM: 16384*128*4 B = 8 MiB per buffer for f32 (4 MiB for
# bf16).  With up to 3 pipeline buffers plus the f32 (14->16, T) temporaries
# and the (1->8, T) output blocks this stays around ~35 MiB -- inside v7x's
# 64 MiB physical VMEM.  On v5e/v6e (128 MiB VMEM) tile_b can be raised to
# 32768-65536 via the `tile_b` argument.  Large tiles amortize the ~0.35 us
# per-grid-step overhead; do not shrink this "GPU-style".
DEFAULT_TILE_B = 16384


def _round_up(x, m):
    return (x + m - 1) // m * m


def _linear1(w1_ref, x_ref):
    """(out, in) x (T, in) -> (out, T) on the MXU.

    NT matmul contracting the minor/feature dims of both operands (the same
    dot_general form flash-attention uses for q @ k^T): builds the (14, T)
    compute layout on-chip so the host never materializes a transposed x."""
    return lax.dot_general(w1_ref[...], x_ref[...],
                           dimension_numbers=(((1,), (1,)), ((), ())),
                           preferred_element_type=jnp.float32)


# ----------------------------- pass 1: BN stats ------------------------------
def _stats_kernel(x_ref, w1_ref, gamma_ref, beta_ref, scale_ref, shift_ref,
                  *, batch, tile_b, ragged):
    i = pl.program_id(0)

    @pl.when(i == 0)
    def _init():
        scale_ref[...] = jnp.zeros_like(scale_ref)
        shift_ref[...] = jnp.zeros_like(shift_ref)

    # Linear(14 -> 14) *without* bias: training-mode BatchNorm immediately
    # after a Linear layer absorbs the bias exactly, so b1 never enters the
    # kernel (no per-step add, no finalize correction).
    h1 = _linear1(w1_ref, x_ref)                                   # (14, T)

    if ragged:
        # Only emitted when tile_b does not divide the batch: the last tile's
        # out-of-bounds columns hold garbage (x is *not* host-padded) and must
        # not enter the statistics.  Select, not multiply, so NaN/Inf garbage
        # cannot propagate.
        col = i * tile_b + lax.broadcasted_iota(jnp.int32, h1.shape, 1)
        h1 = jnp.where(col < batch, h1, 0.0)

    scale_ref[...] += jnp.sum(h1, axis=1, keepdims=True)           # sum(h1)
    shift_ref[...] += jnp.sum(h1 * h1, axis=1, keepdims=True)      # sum(h1^2)

    @pl.when(i == pl.num_programs(0) - 1)
    def _finalize():
        inv_b = 1.0 / batch
        mean = scale_ref[...] * inv_b
        # Biased variance (PyTorch BN normalization).  Guard the cancellation-
        # prone E[x^2] - E[x]^2 form against tiny negative results.
        var = jnp.maximum(shift_ref[...] * inv_b - mean * mean, 0.0)
        sc = gamma_ref[...] * lax.rsqrt(var + EPS)
        scale_ref[...] = sc                          # folded BN scale
        shift_ref[...] = beta_ref[...] - mean * sc   # folded BN shift (b1-free)


# ----------------------------- pass 2: forward --------------------------------
def _fwd_kernel(x_ref, w1_ref, scale_ref, shift_ref, w2_ref, b2_ref,
                w3_ref, b3_ref, out_ref):
    # Linear(14 -> 14) (bias folded into the BN shift), folded BN (one FMA),
    # ReLU.  All in the (14, T) lane-dense layout.
    h1 = _linear1(w1_ref, x_ref)                                      # (14, T)
    h = jnp.maximum(h1 * scale_ref[...] + shift_ref[...], 0.0)        # (14, T)

    # Linear(14 -> 4) + ReLU on the (otherwise idle) MXU.
    h2 = jnp.dot(w2_ref[...], h, preferred_element_type=jnp.float32)  # (4, T)
    h2 = jnp.maximum(h2 + b2_ref[...], 0.0)

    # Linear(4 -> 1) + Sigmoid on the VPU; result is a lane-dense (1, T) row.
    h3 = jnp.sum(h2 * w3_ref[...], axis=0, keepdims=True) + b3_ref[...]
    out_ref[...] = jax.nn.sigmoid(h3)


# ----------------------------------- wrapper ----------------------------------
def _dnn_forward(x, params, *, tile_b=None):
    b, d = x.shape
    assert d == INPUT_DIM
    w1, b1, gamma, beta, w2, b2, w3, b3 = params
    del b1   # absorbed exactly by training-mode BatchNorm; see _stats_kernel

    if tile_b is None:
        tile_b = DEFAULT_TILE_B
    tile_b = _round_up(min(tile_b, _round_up(b, 128)), 128)
    num_tiles = int(pl.cdiv(b, tile_b))
    b_pad = num_tiles * tile_b
    ragged = (b % tile_b) != 0

    # Kernel-side parameter layouts (tiny, O(14^2) elements; negligible cost).
    w1k = w1.astype(x.dtype)                  # low-precision MXU input if x is bf16
    gammak = gamma.reshape(INPUT_DIM, 1).astype(jnp.float32)
    betak = beta.reshape(INPUT_DIM, 1).astype(jnp.float32)
    w2k = w2.astype(jnp.float32)                           # (4, 14) PyTorch layout
    b2k = b2.reshape(HIDDEN2, 1).astype(jnp.float32)
    w3k = w3.reshape(HIDDEN2, 1).astype(jnp.float32)       # column of W3 (1, 4)
    b3k = b3.reshape(1, 1).astype(jnp.float32)

    # x streamed in its natural (B, 14) layout: the block spans the full minor
    # dim so the HBM side of each DMA is fully contiguous.  No host transpose,
    # no host pad copy.
    if num_tiles > 3:
        # 3-deep pipeline on the only streamed operand: hides DMA issue jitter
        # when per-step time is short (v7x); only pays with more steps than
        # buffers.
        x_spec = pl.BlockSpec((tile_b, INPUT_DIM), lambda i: (i, 0),
                              pipeline_mode=pl.Buffered(3))
    else:
        x_spec = pl.BlockSpec((tile_b, INPUT_DIM), lambda i: (i, 0))
    w1_spec = pl.BlockSpec((INPUT_DIM, INPUT_DIM), lambda i: (0, 0))
    col_spec = pl.BlockSpec((INPUT_DIM, 1), lambda i: (0, 0))

    def compiler_params(semantics):
        # Lane-padded footprint of up to 3 x buffers + f32 (14->16, T) temps +
        # (1->8, T) output blocks.  Raise the scoped VMEM limit only when the
        # default (16 MiB on v5e, 32 MiB on v6e/v7x) would be too small, and
        # keep the request below v7x's 64 MiB physical VMEM.
        need = 3 * tile_b * 128 * x.dtype.itemsize + 8 * 16 * tile_b * 4
        vmem_limit = None
        if need > (12 << 20):
            vmem_limit = int(min(max(need * 3 // 2, 32 << 20), 60 << 20))
        return pltpu.CompilerParams(dimension_semantics=semantics,
                                    vmem_limit_bytes=vmem_limit)

    bytes_x = b * INPUT_DIM * x.dtype.itemsize

    # ---- pass 1: accumulate batch statistics, emit folded BN scale/shift ----
    scale, shift = pl.pallas_call(
        functools.partial(_stats_kernel, batch=b, tile_b=tile_b, ragged=ragged),
        grid=(num_tiles,),
        in_specs=[x_spec, w1_spec, col_spec, col_spec],
        out_specs=(col_spec, col_spec),
        out_shape=(jax.ShapeDtypeStruct((INPUT_DIM, 1), jnp.float32),
                   jax.ShapeDtypeStruct((INPUT_DIM, 1), jnp.float32)),
        compiler_params=compiler_params(("arbitrary",)),   # carried accumulators
        cost_estimate=pl.CostEstimate(
            flops=b * (2 * INPUT_DIM * INPUT_DIM + 4 * INPUT_DIM),
            transcendentals=0,
            bytes_accessed=bytes_x + 8 * INPUT_DIM * 4),
    )(x, w1k, gammak, betak)

    # ---- pass 2: full forward, one lane-dense (1, tile_b) output row / tile --
    out = pl.pallas_call(
        _fwd_kernel,
        grid=(num_tiles,),
        in_specs=[x_spec, w1_spec, col_spec, col_spec,
                  pl.BlockSpec((HIDDEN2, INPUT_DIM), lambda i: (0, 0)),
                  pl.BlockSpec((HIDDEN2, 1), lambda i: (0, 0)),
                  pl.BlockSpec((HIDDEN2, 1), lambda i: (0, 0)),
                  pl.BlockSpec((1, 1), lambda i: (0, 0))],
        out_specs=pl.BlockSpec((1, tile_b), lambda i: (0, i)),
        out_shape=jax.ShapeDtypeStruct((1, b_pad), jnp.float32),
        compiler_params=compiler_params(("parallel",)),    # megacore-shardable
        cost_estimate=pl.CostEstimate(
            flops=b * (2 * INPUT_DIM * INPUT_DIM + 3 * INPUT_DIM
                       + 2 * INPUT_DIM * HIDDEN2 + 4 * HIDDEN2 + 4),
            transcendentals=b,
            bytes_accessed=bytes_x + b_pad * 4),
    )(x, w1k, scale, shift, w2k, b2k, w3k, b3k)

    return out[0, :b]                                      # squeeze(1) -> (B,)


dnn_forward = jax.jit(_dnn_forward, static_argnames=("tile_b",))


def init_params(key, input_dim=INPUT_DIM):
    ks = jax.random.split(key, 8)
    bf16x = lambda a: a.astype(jnp.bfloat16).astype(jnp.float32)
    # PyTorch layouts: W is (out, in), b is (out,).  W1 is bf16-rounded so the
    # cast to the (bf16) x dtype for the MXU is exact -> tight test tolerance.
    w1 = bf16x(jax.random.normal(ks[0], (input_dim, input_dim), jnp.float32)
               / jnp.sqrt(input_dim))
    b1 = jax.random.normal(ks[1], (input_dim,), jnp.float32) * 0.1
    gamma = 1.0 + 0.1 * jax.random.normal(ks[2], (input_dim,), jnp.float32)
    beta = 0.1 * jax.random.normal(ks[3], (input_dim,), jnp.float32)
    w2 = (jax.random.normal(ks[4], (HIDDEN2, input_dim), jnp.float32)
          / jnp.sqrt(input_dim))
    b2 = jax.random.normal(ks[5], (HIDDEN2,), jnp.float32) * 0.1
    w3 = jax.random.normal(ks[6], (1, HIDDEN2), jnp.float32) / jnp.sqrt(HIDDEN2)
    b3 = jax.random.normal(ks[7], (1,), jnp.float32) * 0.1
    return (w1, b1, gamma, beta, w2, b2, w3, b3)


def reference_forward(x, params):
    """Pure NumPy (float64) reference mirroring the PyTorch module, *including*
    the Linear-1 bias (training-mode BatchNorm1d: per-batch mean, biased var);
    verifies that dropping b1 inside the kernel is mathematically exact."""
    x = np.asarray(x, np.float64)
    w1, b1, gamma, beta, w2, b2, w3, b3 = [np.asarray(p, np.float64)
                                           for p in params]
    h1 = x @ w1.T + b1
    mean = h1.mean(axis=0)
    var = ((h1 - mean) ** 2).mean(axis=0)
    h = np.maximum((h1 - mean) / np.sqrt(var + EPS) * gamma + beta, 0.0)
    h2 = np.maximum(h @ w2.T + b2, 0.0)
    h3 = h2 @ w3.T + b3
    return 1.0 / (1.0 + np.exp(-h3[:, 0]))


if __name__ == "__main__":
    key = jax.random.PRNGKey(0)
    kx, kp = jax.random.split(key)
    B = 300   # not a multiple of the tile -> exercises the ragged-tile mask
    # bf16 input: halves the dominant HBM stream; bf16 values are exactly
    # representable so the float64 reference sees the same numbers.
    x = jax.random.normal(kx, (B, INPUT_DIM), jnp.float32).astype(jnp.bfloat16)
    params = init_params(kp)

    ref = jnp.asarray(reference_forward(x, params), jnp.float32)

    # Multi-tile path (3 grid steps: 128 + 128 + 44 valid columns) and the
    # default single-tile path.
    for tb in (128, None):
        out = jax.block_until_ready(dnn_forward(x, params, tile_b=tb))
        assert out.shape == (B,)
        err = float(jnp.max(jnp.abs(out - ref)))
        assert err < 1e-4, f"tile_b={tb}: max abs err {err}"
    print("KERNEL_OK")
</pallas_src>

<mosaic_0001>
module attributes {stable_mosaic.version = 11 : i64} {
  func.func @_stats_kernel(%arg0: i32, %arg1: memref<128x14xbf16, #tpu.memory_space<vmem>>, %arg2: memref<14x14xbf16, #tpu.memory_space<vmem>>, %arg3: memref<14x1xf32, #tpu.memory_space<vmem>>, %arg4: memref<14x1xf32, #tpu.memory_space<vmem>>, %arg5: memref<14x1xf32, #tpu.memory_space<vmem>>, %arg6: memref<14x1xf32, #tpu.memory_space<vmem>>) attributes {dimension_semantics = [#tpu.dimension_semantics<arbitrary>], iteration_bounds = array<i64: 3>, scalar_prefetch = 0 : i64, scratch_operands = 0 : i64, tpu.core_type = #tpu.core_type<tc>, window_params = [{transform_indices = @transform_0, window_bounds = array<i64: 128, 14>}, {pipeline_mode = #tpu.pipeline_mode<synchronous>, transform_indices = @transform_1, window_bounds = array<i64: 14, 14>}, {pipeline_mode = #tpu.pipeline_mode<synchronous>, transform_indices = @transform_2, window_bounds = array<i64: 14, 1>}, {pipeline_mode = #tpu.pipeline_mode<synchronous>, transform_indices = @transform_3, window_bounds = array<i64: 14, 1>}, {pipeline_mode = #tpu.pipeline_mode<synchronous>, transform_indices = @transform_4, window_bounds = array<i64: 14, 1>}, {pipeline_mode = #tpu.pipeline_mode<synchronous>, transform_indices = @transform_5, window_bounds = array<i64: 14, 1>}]} {
    %c0_i32 = arith.constant 0 : i32
    %0 = arith.cmpi eq, %arg0, %c0_i32 : i32
    %1 = arith.extui %0 : i1 to i32
    %c0_i32_0 = arith.constant 0 : i32
    %2 = arith.cmpi ne, %1, %c0_i32_0 : i32
    scf.if %2 {
      %cst_16 = arith.constant 0.000000e+00 : f32
      %28 = vector.broadcast %cst_16 : f32 to vector<14x1xf32>
      %c0_17 = arith.constant 0 : index
      %c0_18 = arith.constant 0 : index
      %29 = vector.load %arg5[%c0_17, %c0_18] : memref<14x1xf32, #tpu.memory_space<vmem>>, vector<14x1xf32>
      tpu.vector_store %arg5[%c0_17, %c0_18], %28 {strides = array<i32>} : memref<14x1xf32, #tpu.memory_space<vmem>>, vector<14x1xf32>,
      %cst_19 = arith.constant 0.000000e+00 : f32
      %30 = vector.broadcast %cst_19 : f32 to vector<14x1xf32>
      %c0_20 = arith.constant 0 : index
      %c0_21 = arith.constant 0 : index
      %31 = vector.load %arg6[%c0_20, %c0_21] : memref<14x1xf32, #tpu.memory_space<vmem>>, vector<14x1xf32>
      tpu.vector_store %arg6[%c0_20, %c0_21], %30 {strides = array<i32>} : memref<14x1xf32, #tpu.memory_space<vmem>>, vector<14x1xf32>,
    } else {
    }
    %c0 = arith.constant 0 : index
    %c0_1 = arith.constant 0 : index
    %3 = vector.load %arg2[%c0, %c0_1] : memref<14x14xbf16, #tpu.memory_space<vmem>>, vector<14x14xbf16>
    %c0_2 = arith.constant 0 : index
    %c0_3 = arith.constant 0 : index
    %4 = vector.load %arg1[%c0_2, %c0_3] : memref<128x14xbf16, #tpu.memory_space<vmem>>, vector<128x14xbf16>
    %cst = arith.constant dense<0.000000e+00> : vector<14x128xf32>
    %5 = tpu.matmul %3, %4, %cst {dimension_numbers = #tpu.dot_dimension_numbers<[1], [1], [0], [0], [0, 0, 1, 0], [], []>} : vector<14x14xbf16>, vector<128x14xbf16>, vector<14x128xf32> -> vector<14x128xf32>
    %c128_i32 = arith.constant 128 : i32
    %6 = arith.muli %arg0, %c128_i32 : i32
    %7 = tpu.iota {dimensions = array<i32: 1>} : vector<14x128xi32>
    %8 = vector.broadcast %6 : i32 to vector<14x128xi32>
    %9 = arith.addi %8, %7 : vector<14x128xi32>
    %c300_i32 = arith.constant 300 : i32
    %10 = vector.broadcast %c300_i32 : i32 to vector<14x128xi32>
    %11 = arith.cmpi slt, %9, %10 : vector<14x128xi32>
    %cst_4 = arith.constant 0.000000e+00 : f32
    %12 = vector.broadcast %cst_4 : f32 to vector<14x128xf32>
    %13 = arith.select %11, %5, %12 : vector<14x128xi1>, vector<14x128xf32>
    %c0_5 = arith.constant 0 : index
    %c0_6 = arith.constant 0 : index
    %14 = vector.load %arg5[%c0_5, %c0_6] : memref<14x1xf32, #tpu.memory_space<vmem>>, vector<14x1xf32>
    %cst_7 = arith.constant dense<0.000000e+00> : vector<14xf32>
    %15 = vector.multi_reduction <add>, %13, %cst_7 [1] : vector<14x128xf32> to vector<14xf32>
    %16 = vector.shape_cast %15 : vector<14xf32> to vector<14x1xf32>
    %17 = arith.addf %14, %16 : vector<14x1xf32>
    %c0_8 = arith.constant 0 : index
    %c0_9 = arith.constant 0 : index
    %18 = vector.load %arg5[%c0_8, %c0_9] : memref<14x1xf32, #tpu.memory_space<vmem>>, vector<14x1xf32>
    tpu.vector_store %arg5[%c0_8, %c0_9], %17 {strides = array<i32>} : memref<14x1xf32, #tpu.memory_space<vmem>>, vector<14x1xf32>,
    %c0_10 = arith.constant 0 : index
    %c0_11 = arith.constant 0 : index
    %19 = vector.load %arg6[%c0_10, %c0_11] : memref<14x1xf32, #tpu.memory_space<vmem>>, vector<14x1xf32>
    %20 = arith.mulf %13, %13 : vector<14x128xf32>
    %cst_12 = arith.constant dense<0.000000e+00> : vector<14xf32>
    %21 = vector.multi_reduction <add>, %20, %cst_12 [1] : vector<14x128xf32> to vector<14xf32>
    %22 = vector.shape_cast %21 : vector<14xf32> to vector<14x1xf32>
    %23 = arith.addf %19, %22 : vector<14x1xf32>
    %c0_13 = arith.constant 0 : index
    %c0_14 = arith.constant 0 : index
    %24 = vector.load %arg6[%c0_13, %c0_14] : memref<14x1xf32, #tpu.memory_space<vmem>>, vector<14x1xf32>
    tpu.vector_store %arg6[%c0_13, %c0_14], %23 {strides = array<i32>} : memref<14x1xf32, #tpu.memory_space<vmem>>, vector<14x1xf32>,
    %c2_i32 = arith.constant 2 : i32
    %25 = arith.cmpi eq, %arg0, %c2_i32 : i32
    %26 = arith.extui %25 : i1 to i32
    %c0_i32_15 = arith.constant 0 : i32
    %27 = arith.cmpi ne, %26, %c0_i32_15 : i32
    scf.if %27 {
      %c0_16 = arith.constant 0 : index
      %c0_17 = arith.constant 0 : index
      %28 = vector.load %arg5[%c0_16, %c0_17] : memref<14x1xf32, #tpu.memory_space<vmem>>, vector<14x1xf32>
      %cst_18 = arith.constant 0.00333333341 : f32
      %29 = vector.broadcast %cst_18 : f32 to vector<14x1xf32>
      %30 = arith.mulf %28, %29 : vector<14x1xf32>
      %c0_19 = arith.constant 0 : index
      %c0_20 = arith.constant 0 : index
      %31 = vector.load %arg6[%c0_19, %c0_20] : memref<14x1xf32, #tpu.memory_space<vmem>>, vector<14x1xf32>
      %cst_21 = arith.constant 0.00333333341 : f32
      %32 = vector.broadcast %cst_21 : f32 to vector<14x1xf32>
      %33 = arith.mulf %31, %32 : vector<14x1xf32>
      %34 = arith.mulf %30, %30 : vector<14x1xf32>
      %35 = arith.subf %33, %34 : vector<14x1xf32>
      %cst_22 = arith.constant 0.000000e+00 : f32
      %36 = vector.broadcast %cst_22 : f32 to vector<14x1xf32>
      %37 = arith.maximumf %35, %36 : vector<14x1xf32>
      %c0_23 = arith.constant 0 : index
      %c0_24 = arith.constant 0 : index
      %38 = vector.load %arg3[%c0_23, %c0_24] : memref<14x1xf32, #tpu.memory_space<vmem>>, vector<14x1xf32>
      %cst_25 = arith.constant 9.99999974E-6 : f32
      %39 = vector.broadcast %cst_25 : f32 to vector<14x1xf32>
      %40 = arith.addf %37, %39 : vector<14x1xf32>
      %41 = math.rsqrt %40 : vector<14x1xf32>
      %42 = arith.mulf %38, %41 : vector<14x1xf32>
      %c0_26 = arith.constant 0 : index
      %c0_27 = arith.constant 0 : index
      %43 = vector.load %arg5[%c0_26, %c0_27] : memref<14x1xf32, #tpu.memory_space<vmem>>, vector<14x1xf32>
      tpu.vector_store %arg5[%c0_26, %c0_27], %42 {strides = array<i32>} : memref<14x1xf32, #tpu.memory_space<vmem>>, vector<14x1xf32>,
      %c0_28 = arith.constant 0 : index
      %c0_29 = arith.constant 0 : index
      %44 = vector.load %arg4[%c0_28, %c0_29] : memref<14x1xf32, #tpu.memory_space<vmem>>, vector<14x1xf32>
      %45 = arith.mulf %30, %42 : vector<14x1xf32>
      %46 = arith.subf %44, %45 : vector<14x1xf32>
      %c0_30 = arith.constant 0 : index
      %c0_31 = arith.constant 0 : index
      %47 = vector.load %arg6[%c0_30, %c0_31] : memref<14x1xf32, #tpu.memory_space<vmem>>, vector<14x1xf32>
      tpu.vector_store %arg6[%c0_30, %c0_31], %46 {strides = array<i32>} : memref<14x1xf32, #tpu.memory_space<vmem>>, vector<14x1xf32>,
    } else {
    }
    return
  }
  func.func @transform_0(%arg0: i32) -> (i32, i32) {
    %c0_i32 = arith.constant 0 : i32
    %c0_i32_0 = arith.constant 0 : i32
    return %arg0, %c0_i32 : i32, i32
  }
  func.func @transform_1(%arg0: i32) -> (i32, i32) {
    %c0_i32 = arith.constant 0 : i32
    %c0_i32_0 = arith.constant 0 : i32
    %c0_i32_1 = arith.constant 0 : i32
    return %c0_i32, %c0_i32_0 : i32, i32
  }
  func.func @transform_2(%arg0: i32) -> (i32, i32) {
    %c0_i32 = arith.constant 0 : i32
    %c0_i32_0 = arith.constant 0 : i32
    %c0_i32_1 = arith.constant 0 : i32
    return %c0_i32, %c0_i32_0 : i32, i32
  }
  func.func @transform_3(%arg0: i32) -> (i32, i32) {
    %c0_i32 = arith.constant 0 : i32
    %c0_i32_0 = arith.constant 0 : i32
    %c0_i32_1 = arith.constant 0 : i32
    return %c0_i32, %c0_i32_0 : i32, i32
  }
  func.func @transform_4(%arg0: i32) -> (i32, i32) {
    %c0_i32 = arith.constant 0 : i32
    %c0_i32_0 = arith.constant 0 : i32
    %c0_i32_1 = arith.constant 0 : i32
    return %c0_i32, %c0_i32_0 : i32, i32
  }
  func.func @transform_5(%arg0: i32) -> (i32, i32) {
    %c0_i32 = arith.constant 0 : i32
    %c0_i32_0 = arith.constant 0 : i32
    %c0_i32_1 = arith.constant 0 : i32
    return %c0_i32, %c0_i32_0 : i32, i32
  }
}

module attributes {stable_mosaic.version = 11 : i64} {
  func.func @_fwd_kernel(%arg0: i32, %arg1: memref<128x14xbf16, #tpu.memory_space<vmem>>, %arg2: memref<14x14xbf16, #tpu.memory_space<vmem>>, %arg3: memref<14x1xf32, #tpu.memory_space<vmem>>, %arg4: memref<14x1xf32, #tpu.memory_space<vmem>>, %arg5: memref<4x14xf32, #tpu.memory_space<vmem>>, %arg6: memref<4x1xf32, #tpu.memory_space<vmem>>, %arg7: memref<4x1xf32, #tpu.memory_space<vmem>>, %arg8: memref<1x1xf32, #tpu.memory_space<vmem>>, %arg9: memref<1x128xf32, #tpu.memory_space<vmem>>) attributes {dimension_semantics = [#tpu.dimension_semantics<parallel>], iteration_bounds = array<i64: 3>, scalar_prefetch = 0 : i64, scratch_operands = 0 : i64, tpu.core_type = #tpu.core_type<tc>, window_params = [{transform_indices = @transform_0, window_bounds = array<i64: 128, 14>}, {pipeline_mode = #tpu.pipeline_mode<synchronous>, transform_indices = @transform_1, window_bounds = array<i64: 14, 14>}, {pipeline_mode = #tpu.pipeline_mode<synchronous>, transform_indices = @transform_2, window_bounds = array<i64: 14, 1>}, {pipeline_mode = #tpu.pipeline_mode<synchronous>, transform_indices = @transform_3, window_bounds = array<i64: 14, 1>}, {pipeline_mode = #tpu.pipeline_mode<synchronous>, transform_indices = @transform_4, window_bounds = array<i64: 4, 14>}, {pipeline_mode = #tpu.pipeline_mode<synchronous>, transform_indices = @transform_5, window_bounds = array<i64: 4, 1>}, {pipeline_mode = #tpu.pipeline_mode<synchronous>, transform_indices = @transform_6, window_bounds = array<i64: 4, 1>}, {pipeline_mode = #tpu.pipeline_mode<synchronous>, transform_indices = @transform_7, window_bounds = array<i64: 1, 1>}, {transform_indices = @transform_8, window_bounds = array<i64: 1, 128>}]} {
    %c0 = arith.constant 0 : index
    %c0_0 = arith.constant 0 : index
    %0 = vector.load %arg2[%c0, %c0_0] : memref<14x14xbf16, #tpu.memory_space<vmem>>, vector<14x14xbf16>
    %c0_1 = arith.constant 0 : index
    %c0_2 = arith.constant 0 : index
    %1 = vector.load %arg1[%c0_1, %c0_2] : memref<128x14xbf16, #tpu.memory_space<vmem>>, vector<128x14xbf16>
    %cst = arith.constant dense<0.000000e+00> : vector<14x128xf32>
    %2 = tpu.matmul %0, %1, %cst {dimension_numbers = #tpu.dot_dimension_numbers<[1], [1], [0], [0], [0, 0, 1, 0], [], []>} : vector<14x14xbf16>, vector<128x14xbf16>, vector<14x128xf32> -> vector<14x128xf32>
    %c0_3 = arith.constant 0 : index
    %c0_4 = arith.constant 0 : index
    %3 = vector.load %arg3[%c0_3, %c0_4] : memref<14x1xf32, #tpu.memory_space<vmem>>, vector<14x1xf32>
    %4 = vector.broadcast %3 : vector<14x1xf32> to vector<14x128xf32>
    %5 = arith.mulf %2, %4 : vector<14x128xf32>
    %c0_5 = arith.constant 0 : index
    %c0_6 = arith.constant 0 : index
    %6 = vector.load %arg4[%c0_5, %c0_6] : memref<14x1xf32, #tpu.memory_space<vmem>>, vector<14x1xf32>
    %7 = vector.broadcast %6 : vector<14x1xf32> to vector<14x128xf32>
    %8 = arith.addf %5, %7 : vector<14x128xf32>
    %cst_7 = arith.constant 0.000000e+00 : f32
    %9 = vector.broadcast %cst_7 : f32 to vector<14x128xf32>
    %10 = arith.maximumf %8, %9 : vector<14x128xf32>
    %c0_8 = arith.constant 0 : index
    %c0_9 = arith.constant 0 : index
    %11 = vector.load %arg5[%c0_8, %c0_9] : memref<4x14xf32, #tpu.memory_space<vmem>>, vector<4x14xf32>
    %cst_10 = arith.constant dense<0.000000e+00> : vector<4x128xf32>
    %12 = tpu.matmul %11, %10, %cst_10 {dimension_numbers = #tpu.dot_dimension_numbers<[1], [0], [0], [1], [0, 0, 1, 1], [], []>} : vector<4x14xf32>, vector<14x128xf32>, vector<4x128xf32> -> vector<4x128xf32>
    %c0_11 = arith.constant 0 : index
    %c0_12 = arith.constant 0 : index
    %13 = vector.load %arg6[%c0_11, %c0_12] : memref<4x1xf32, #tpu.memory_space<vmem>>, vector<4x1xf32>
    %14 = vector.broadcast %13 : vector<4x1xf32> to vector<4x128xf32>
    %15 = arith.addf %12, %14 : vector<4x128xf32>
    %cst_13 = arith.constant 0.000000e+00 : f32
    %16 = vector.broadcast %cst_13 : f32 to vector<4x128xf32>
    %17 = arith.maximumf %15, %16 : vector<4x128xf32>
    %c0_14 = arith.constant 0 : index
    %c0_15 = arith.constant 0 : index
    %18 = vector.load %arg7[%c0_14, %c0_15] : memref<4x1xf32, #tpu.memory_space<vmem>>, vector<4x1xf32>
    %19 = vector.broadcast %18 : vector<4x1xf32> to vector<4x128xf32>
    %20 = arith.mulf %17, %19 : vector<4x128xf32>
    %cst_16 = arith.constant dense<0.000000e+00> : vector<128xf32>
    %21 = vector.multi_reduction <add>, %20, %cst_16 [0] : vector<4x128xf32> to vector<128xf32>
    %22 = vector.shape_cast %21 : vector<128xf32> to vector<1x128xf32>
    %c0_17 = arith.constant 0 : index
    %c0_18 = arith.constant 0 : index
    %23 = vector.load %arg8[%c0_17, %c0_18] : memref<1x1xf32, #tpu.memory_space<vmem>>, vector<1x1xf32>
    %24 = vector.broadcast %23 : vector<1x1xf32> to vector<1x128xf32>
    %25 = arith.addf %22, %24 : vector<1x128xf32>
    %26 = arith.negf %25 : vector<1x128xf32>
    %27 = math.exp %26 : vector<1x128xf32>
    %cst_19 = arith.constant 1.000000e+00 : f32
    %28 = vector.broadcast %cst_19 : f32 to vector<1x128xf32>
    %29 = arith.addf %28, %27 : vector<1x128xf32>
    %30 = arith.divf %28, %29 : vector<1x128xf32>
    %c0_20 = arith.constant 0 : index
    %c0_21 = arith.constant 0 : index
    %31 = vector.load %arg9[%c0_20, %c0_21] : memref<1x128xf32, #tpu.memory_space<vmem>>, vector<1x128xf32>
    tpu.vector_store %arg9[%c0_20, %c0_21], %30 {strides = array<i32>} : memref<1x128xf32, #tpu.memory_space<vmem>>, vector<1x128xf32>,
    return
  }
  func.func @transform_0(%arg0: i32) -> (i32, i32) {
    %c0_i32 = arith.constant 0 : i32
    %c0_i32_0 = arith.constant 0 : i32
    return %arg0, %c0_i32 : i32, i32
  }
  func.func @transform_1(%arg0: i32) -> (i32, i32) {
    %c0_i32 = arith.constant 0 : i32
    %c0_i32_0 = arith.constant 0 : i32
    %c0_i32_1 = arith.constant 0 : i32
    return %c0_i32, %c0_i32_0 : i32, i32
  }
  func.func @transform_2(%arg0: i32) -> (i32, i32) {
    %c0_i32 = arith.constant 0 : i32
    %c0_i32_0 = arith.constant 0 : i32
    %c0_i32_1 = arith.constant 0 : i32
    return %c0_i32, %c0_i32_0 : i32, i32
  }
  func.func @transform_3(%arg0: i32) -> (i32, i32) {
    %c0_i32 = arith.constant 0 : i32
    %c0_i32_0 = arith.constant 0 : i32
    %c0_i32_1 = arith.constant 0 : i32
    return %c0_i32, %c0_i32_0 : i32, i32
  }
  func.func @transform_4(%arg0: i32) -> (i32, i32) {
    %c0_i32 = arith.constant 0 : i32
    %c0_i32_0 = arith.constant 0 : i32
    %c0_i32_1 = arith.constant 0 : i32
    return %c0_i32, %c0_i32_0 : i32, i32
  }
  func.func @transform_5(%arg0: i32) -> (i32, i32) {
    %c0_i32 = arith.constant 0 : i32
    %c0_i32_0 = arith.constant 0 : i32
    %c0_i32_1 = arith.constant 0 : i32
    return %c0_i32, %c0_i32_0 : i32, i32
  }
  func.func @transform_6(%arg0: i32) -> (i32, i32) {
    %c0_i32 = arith.constant 0 : i32
    %c0_i32_0 = arith.constant 0 : i32
    %c0_i32_1 = arith.constant 0 : i32
    return %c0_i32, %c0_i32_0 : i32, i32
  }
  func.func @transform_7(%arg0: i32) -> (i32, i32) {
    %c0_i32 = arith.constant 0 : i32
    %c0_i32_0 = arith.constant 0 : i32
    %c0_i32_1 = arith.constant 0 : i32
    return %c0_i32, %c0_i32_0 : i32, i32
  }
  func.func @transform_8(%arg0: i32) -> (i32, i32) {
    %c0_i32 = arith.constant 0 : i32
    %c0_i32_0 = arith.constant 0 : i32
    return %c0_i32, %arg0 : i32, i32
  }
}

</mosaic_0001>

<bundles_post_ra>
// kernel: _dnn_forward.2
= control target key start
LH: loop header
LB: loop body
LE: loop exit
PB: predicated region body
PF: predicated region fallthrough
CT: control target
= control target key end

     0   :  { %s593_s18 = smov 0   ;;  %s715_s0 = inlined_call_operand.vmem [shape: bf16[300,14], index: 0, kind: input, shape index: {}]   ;;  %s716_s1 = inlined_call_operand.vmem [shape: bf16[14,14], index: 1, kind: input, shape index: {}]   ;;  %s717_s2 = inlined_call_operand.vmem [shape: f32[14,1], index: 2, kind: input, shape index: {}]   ;;  %s718_s3 = inlined_call_operand.vmem [shape: f32[14,1], index: 3, kind: input, shape index: {}]   ;;  %s719_s4 = inlined_call_operand.vmem [shape: f32[14,1], index: 4, kind: output, shape index: {0}]   ;;  %s720_s5 = inlined_call_operand.vmem [shape: f32[14,1], index: 5, kind: output, shape index: {1}]  }
   0x1 LB: > { %s599_s19 = sadd.s32 4294967295, %s558_s18   ;;  %p481_p0 = scmp.ge.s32.totalorder %s558_s18, 1  ;;  %s558_s18 = sphi %s593_s18, %s16_s18  }
   0x2   : > { %p189_p1 = scmp.lt.s32.totalorder %s558_s18, 4 }
   0x4   : > { %p190_p2 = pnand %p481_p0, %p189_p1 }
   0x5   : > { %s482_s20 = sshll.u32 (!%p190_p2), %s599_s19, 4  ;;  %p484_p4 = scmp.ne.s32.totalorder (!%p190_p2), %s599_s19, 0 }
   0x6   : > { %193 = sbr.rel (%p190_p2) target bundleno = 482 (0x1e2), region = 36  ;;  %p221_p3 = scmp.lt.s32.totalorder (!%p190_p2), %s482_s20, 37 }
   0xd   : > { %s722_s20 = smov (!%p221_p3, %s482_s20), 37  ;;  %234 = sbr.rel (%p484_p4) target bundleno = 20 (0x14), region = 40 }
   0xe   : > { %s483_s21 = sshll.u32 %s722_s20, 2  ;;  %vm235_vm0 = vcmask (!%p484_p4), 7168   ;;  %vm237_vm1 = vcmask (!%p484_p4), 5120   ;;  %v560_v0 = vmov (!%p484_p4), 0.0  }
   0xf   : > { %s607_s24 = scalar_lea.vmem %s715_s0, %s483_s21  ;;  %236 = vst.msk [vmem:[%s719_s4] sm:$0xff] (!%p484_p4), %vm235_vm0, %v560_v0  ;;  %239 = vst.msk [vmem:[%s720_s5] sm:$0xff] (!%p484_p4), %vm235_vm0, %v560_v0 }
  0x10   : > { %238 = vst.msk [vmem:[%s719_s4 + $0x8] sm:$0x3f] (!%p484_p4), %vm237_vm1, %v560_v0  ;;  %240 = vst.msk [vmem:[%s720_s5 + $0x8] sm:$0x3f] (!%p484_p4), %vm237_vm1, %v560_v0 }
  0x14 PF: > { %v539_v1 = vld [vmem:[%s607_s24] sm:$0xff]   ;;  %v561_v2 = vmov 0.0   ;;  %vm304_vm2 = vcmask 113664   ;;  %v540_v4 = vld [vmem:[%s607_s24 + $0x8] sm:$0xff]   ;;  %vm562_vm3 = vmmov 0   ;;  %v541_v6 = vld [vmem:[%s607_s24 + $0x10] sm:$0xff]   ;;  %v374_v19 = vlaneseq }
  0x15   : > { %508 = vmatprep.subr.bf16.mxu0 %v561_v2  ;;  %v309_v3 = vsel %vm304_vm2, %v539_v1, 0  ;;  %v312_v5 = vsel %vm304_vm2, %v540_v4, 0  ;;  %524 = vmatprep.mubr.msk.bf16.mxu0 %vm562_vm3, %v561_v2  ;;  %v315_v7 = vsel %vm304_vm2, %v541_v6, 0  ;;  %v542_v8 = vld [vmem:[%s607_s24 + $0x18] sm:$0xff]   ;;  %v543_v10 = vld [vmem:[%s607_s24 + $0x20] sm:$0xff]   ;;  %v544_v12 = vld [vmem:[%s607_s24 + $0x28] sm:$0xff]  }
  0x16   : > { %509 = vmatpush3.bf16.xpose.msra.mxu0 %v309_v3  ;;  %v318_v9 = vsel %vm304_vm2, %v542_v8, 0  ;;  %v321_v11 = vsel %vm304_vm2, %v543_v10, 0  ;;  %v324_v13 = vsel %vm304_vm2, %v544_v12, 0  ;;  %v545_v14 = vld [vmem:[%s607_s24 + $0x30] sm:$0xff]   ;;  %v546_v16 = vld [vmem:[%s607_s24 + $0x38] sm:$0xff]   ;;  %s495_s10 = sshll.u32 %s599_s19, 7 }
  0x17   : > { %510 = vmatprep.subr.bf16.mxu0 %v561_v2  ;;  %v327_v15 = vsel %vm304_vm2, %v545_v14, 0  ;;  %v330_v17 = vsel %vm304_vm2, %v546_v16, 0  ;;  %v547_v18 = vld [vmem:[%s716_s1] sm:$0x7f]   ;;  %v375_v20 = vand.u32 127, %v374_v19  ;;  %v376_v21 = vstv %s495_s10  ;;  %p496_p5 = scmp.ne.s32.totalorder %s599_s19, 2 }
  0x18   : > { %vm385_vm5 = vcmask 1045504   ;;  %v381_v33 = vld [vmem:[%s719_s4] sm:$0xff]  ;;  %vm391_vm6 = vcmask 7168   ;;  %v382_v38 = vld [vmem:[%s719_s4 + $0x8] sm:$0x3f]  ;;  %vm393_vm7 = vcmask 5120  }
  0x19   : > { %v377_v22 = vadd.s32 %v376_v21, %v375_v20  ;;  %v395_v35 = vld [vmem:[%s720_s5] sm:$0xff]  ;;  %v396_v41 = vld [vmem:[%s720_s5 + $0x8] sm:$0x3f] }
  0x1a   : > { %v426_v61 = vld [vmem:[%s717_s2] sm:$0xff] (!%p496_p5)  ;;  %v427_v62 = vld [vmem:[%s717_s2 + $0x8] sm:$0x3f] (!%p496_p5) }
  0x1b   : > { %vm378_vm4 = vcmp.lt.s32.totalorder %v377_v22, 300  ;;  %v436_v3 = vld [vmem:[%s718_s3] sm:$0xff] (!%p496_p5) }
  0x1e   : > { %511 = vmatpush3.bf16.xpose.msra.mxu0 %v312_v5  ;;  %v437_v5 = vld [vmem:[%s718_s3 + $0x8] sm:$0x3f] (!%p496_p5) }
  0x1f   : > { %512 = vmatprep.subr.bf16.mxu0 %v561_v2 }
  0x26   : > { %513 = vmatpush3.bf16.xpose.msra.mxu0 %v315_v7 }
  0x27   : > { %514 = vmatprep.subr.bf16.mxu0 %v561_v2 }
  0x2e   : > { %515 = vmatpush3.bf16.xpose.msra.mxu0 %v318_v9 }
  0x2f   : > { %516 = vmatprep.subr.bf16.mxu0 %v561_v2 }
  0x36   : > { %517 = vmatpush3.bf16.xpose.msra.mxu0 %v321_v11 }
  0x37   : > { %518 = vmatprep.subr.bf16.mxu0 %v561_v2 }
  0x3e   : > { %519 = vmatpush3.bf16.xpose.msra.mxu0 %v324_v13 }
  0x3f   : > { %520 = vmatprep.subr.bf16.mxu0 %v561_v2 }
  0x46   : > { %521 = vmatpush3.bf16.xpose.msra.mxu0 %v327_v15 }
  0x47   : > { %522 = vmatprep.subr.bf16.mxu0 %v561_v2 }
  0x4e   : > { %523 = vmatpush3.bf16.xpose.msra.mxu0 %v330_v17 }
  0x55   : > { %525 = vmatmul.mubr.msk.bf16.vlgmr.msra.gmra.mrb[0].mxu0 %vm304_vm2, %v547_v18 }
 0x128   : > { %v366_v23 = vpop.f32.mrb[0].mxu0 }
 0x129   : > { %v526_v24 = vpop.f32.mrb[1].mxu0  ;;  %v379_v25 = vsel %vm378_vm4, %v366_v23, 0.0 }
 0x12a   : > { %383 = vadd.xlane.f32.xlu0 %v379_v25  ;;  %v369_v26 = vpop.f32.mrb[2].mxu0  ;;  %v397_v27 = vmul.f32 %v379_v25, %v379_v25 }
 0x12b   : > { %v380_v28 = vsel %vm378_vm4, %v369_v26, 0.0  ;;  %v527_v29 = vpop.f32.mrb[3].mxu0 }
 0x12c   : > { %v398_v30 = vmul.f32 %v380_v28, %v380_v28  ;;  %399 = vadd.xlane.f32.xlu1 %v397_v27  ;;  %v386_v31 = vsel %vm385_vm5, %v380_v28, 0.0 }
 0x12e   : > { %387 = vadd.xlane.f32.xlu0 %v386_v31  ;;  %v401_v32 = vsel %vm385_vm5, %v398_v30, 0.0 }
 0x130   : > { %402 = vadd.xlane.f32.xlu1 %v401_v32 }
 0x1b7   : > { %v384_v34 = vpop.xlane.xlu0 %383 }
 0x1b8   : > { %v389_v36 = vadd.f32 %v384_v34, %v381_v33 }
 0x1b9   : > { %v400_v37 = vpop.xlane.xlu1 %399 }
 0x1ba   : > { %392 = vst.msk [vmem:[%s719_s4] sm:$0xff] %vm391_vm6, %v389_v36  ;;  %v404_v39 = vadd.f32 %v400_v37, %v395_v35  ;;  %411 = sbr.rel (%p496_p5) target bundleno = 482 (0x1e2), region = 44 }
 0x1bb   : > { %v388_v40 = vpop.xlane.xlu0 %387 }
 0x1bc   : > { %406 = vst.msk [vmem:[%s720_s5] sm:$0xff] %vm391_vm6, %v404_v39  ;;  %v390_v42 = vadd.f32 %v388_v40, %v382_v38 }
 0x1bd   : > { %v403_v43 = vpop.xlane.xlu1 %402 }
 0x1be   : > { %394 = vst.msk [vmem:[%s719_s4 + $0x8] sm:$0x3f] %vm393_vm7, %v390_v42  ;;  %v405_v44 = vadd.f32 %v403_v43, %v396_v41 }
 0x1c0   : > { %407 = vst.msk [vmem:[%s720_s5 + $0x8] sm:$0x3f] %vm393_vm7, %v405_v44 }
 0x1c1   : > { %v412_v45 = vld [vmem:[%s719_s4] sm:$0xff] }
 0x1c2   : > { %v414_v47 = vmul.f32 0.0033333334, %v412_v45 }
 0x1c3   : > { %v416_v46 = vld [vmem:[%s720_s5] sm:$0xff] }
 0x1c4   : > { %v418_v48 = vmul.f32 0.0033333334, %v416_v46  ;;  %v420_v52 = vmul.f32 %v414_v47, %v414_v47 }
 0x1c5   : > { %v413_v49 = vld [vmem:[%s719_s4 + $0x8] sm:$0x3f] }
 0x1c6   : > { %v415_v50 = vmul.f32 0.0033333334, %v413_v49  ;;  %v422_v55 = vsub.f32 %v418_v48, %v420_v52 }
 0x1c7   : > { %v417_v51 = vld [vmem:[%s720_s5 + $0x8] sm:$0x3f] }
 0x1c8   : > { %v419_v53 = vmul.f32 0.0033333334, %v417_v51  ;;  %v421_v54 = vmul.f32 %v415_v50, %v415_v50  ;;  %v424_v57 = vmax.f32 %v422_v55, 0.0 }
 0x1ca   : > { %v423_v56 = vsub.f32 %v419_v53, %v421_v54  ;;  %v428_v59 = vadd.f32 1e-05, %v424_v57 }
 0x1cc   : > { %v425_v58 = vmax.f32 %v423_v56, 0.0  ;;  %548 = vrsqrt.f32 %v428_v59 }
 0x1ce   : > { %v429_v60 = vadd.f32 1e-05, %v425_v58 }
 0x1d0   : > { %550 = vrsqrt.f32 %v429_v60 }
 0x1d6   : > { %v549_v63 = vpop.eup %548 }
 0x1d7   : > { %v432_v1 = vmul.f32 %v549_v63, %v426_v61 }
 0x1d9   : > { %434 = vst.msk [vmem:[%s719_s4] sm:$0xff] %vm391_vm6, %v432_v1  ;;  %v438_v4 = vmul.f32 %v432_v1, %v414_v47 }
 0x1da   : > { %v551_v0 = vpop.eup %550 }
 0x1db   : > { %v433_v2 = vmul.f32 %v551_v0, %v427_v62  ;;  %v440_v7 = vsub.f32 %v436_v3, %v438_v4 }
 0x1dd   : > { %435 = vst.msk [vmem:[%s719_s4 + $0x8] sm:$0x3f] %vm393_vm7, %v433_v2  ;;  %v439_v6 = vmul.f32 %v433_v2, %v415_v50 }
 0x1de   : > { %442 = vst.msk [vmem:[%s720_s5] sm:$0xff] %vm391_vm6, %v440_v7 }
 0x1df   : > { %v441_v8 = vsub.f32 %v437_v5, %v439_v6 }
 0x1e1   : > { %443 = vst.msk [vmem:[%s720_s5 + $0x8] sm:$0x3f] %vm393_vm7, %v441_v8 }
 0x1e2 PF: > { %s16_s18 = sadd.s32 1, %s558_s18  }
 0x1e3   : > { %p13_p6 = scmp.ge.s32.totalorder %s16_s18, 5  }
 0x1e5   :  { %15 = sbr.rel (!%p13_p6) target bundleno = 1 (0x1), region = 78 }

// kernel: _dnn_forward.3
= control target key start
LH: loop header
LB: loop body
LE: loop exit
PB: predicated region body
PF: predicated region fallthrough
CT: control target
= control target key end

     0   :  { %s808_s29 = smov 0   ;;  %s874_s0 = inlined_call_operand.vmem [shape: bf16[300,14], index: 0, kind: input, shape index: {}]   ;;  %s875_s1 = inlined_call_operand.vmem [shape: bf16[14,14], index: 1, kind: input, shape index: {}]   ;;  %s876_s2 = inlined_call_operand.vmem [shape: f32[14,1], index: 2, kind: input, shape index: {}]   ;;  %s877_s3 = inlined_call_operand.vmem [shape: f32[14,1], index: 3, kind: input, shape index: {}]   ;;  %s878_s4 = inlined_call_operand.vmem [shape: f32[4,14], index: 4, kind: input, shape index: {}]   ;;  %s879_s5 = inlined_call_operand.vmem [shape: f32[4,1], index: 5, kind: input, shape index: {}]   ;;  %s880_s6 = inlined_call_operand.vmem [shape: f32[4,1], index: 6, kind: input, shape index: {}]   ;;  %s881_s7 = inlined_call_operand.<no memory space> [shape: f32[1,1], index: 7, kind: input, shape index: {}]   ;;  %s882_s8 = inlined_call_operand.vmem [shape: f32[1,384], index: 8, kind: output, shape index: {}]  }
   0x1   :  { %v13_v0 = vstv %s881_s7 }
   0x2   :  { %14 = vst [vmem:[#allocation2] sm:$0x1] %v13_v0 }
   0x3 LB: > { %s814_s30 = sadd.s32 4294967295, %s753_s29   ;;  %p658_p0 = scmp.ge.s32.totalorder %s753_s29, 1  ;;  %s753_s29 = sphi %s808_s29, %s20_s29  }
   0x4   : > { %p273_p1 = scmp.lt.s32.totalorder %s753_s29, 4 }
   0x6   : > { %p274_p2 = pnand %p658_p0, %p273_p1 }
   0x7   : > { %s659_s9 = sshll.u32 (!%p274_p2), %s814_s30, 4  ;;  %v755_v1 = vmov (!%p274_p2), 0.0   ;;  %vm756_vm0 = vmmov (!%p274_p2), 0   ;;  %v757_v2 = vmov (!%p274_p2), 0   ;;  %v459_v3 = vld [vmem:[%s876_s2] sm:$0xff] (!%p274_p2)  ;;  %vm390_vm1 = vcmask (!%p274_p2), 113664  }
   0x8   : > { %277 = sbr.rel (%p274_p2) target bundleno = 568 (0x238), region = 52  ;;  %688 = vmatprep.subr.bf16.mxu0 (!%p274_p2), %v755_v1  ;;  %p314_p3 = scmp.lt.s32.totalorder (!%p274_p2), %s659_s9, 37  ;;  %704 = vmatprep.mubr.msk.bf16.mxu0 (!%p274_p2), %vm756_vm0, %v755_v1  ;;  %v473_v4 = vld [vmem:[%s877_s3] sm:$0xff] (!%p274_p2)  ;;  %v460_v5 = vld [vmem:[%s876_s2 + $0x8] sm:$0x3f] (!%p274_p2)  ;;  %v758_v27 = vmov (!%p274_p2), 0.0|0.0   ;;  %v595_v51 = vlaneseq (!%p274_p2) }
   0x9   : > { %732 = vset.pattern.permute.xlu0 (!%p274_p2), %v757_v2  ;;  %733 = vset.pattern.permute.xlu1 (!%p274_p2), %v757_v2  ;;  %v474_v6 = vld [vmem:[%s877_s3 + $0x8] sm:$0x3f] (!%p274_p2)  ;;  %v490_v7 = vld [vmem:[%s879_s5] sm:$0xf] (!%p274_p2)  ;;  %vm499_vm2 = vcmask (!%p274_p2), 1045504   ;;  %vm759_vm3 = vmmov (!%p274_p2), 1  }
   0xa   : > { %463 = vperm.xlu0 (!%p274_p2), %732, %v459_v3   ;;  %477 = vperm.xlu1 (!%p274_p2), %733, %v473_v4   ;;  %v574_v9 = vld [vmem:[%s880_s6] sm:$0xf] (!%p274_p2)  ;;  %vm717_vm4 = vmpackc.low (!%p274_p2), %vm499_vm2, %vm759_vm3  ;;  %vm581_vm5 = vcmask (!%p274_p2), 1043456   ;;  %v596_v54 = vshrl.u32 (!%p274_p2), %v595_v51, 7  ;;  %p323_p4 = scmp.lt.s32.totalorder (!%p274_p2), %s814_s30, 2 }
   0xb   : > { %712 = vmatprep.mubr.msk.f32.mxu1 (!%p274_p2), %vm756_vm0, %v755_v1  ;;  %v589_v12 = vld [vmem:[#allocation2] sm:$0x1] (!%p274_p2)  ;;  %715 = vmatprep.subr.bf16.mxu1 (!%p274_p2), %v758_v27 }
   0xc   : > { %v742_v26 = vld [vmem:[%s875_s1] sm:$0x7f] (!%p274_p2)   ;;  %v597_v57 = vsub.s32 (!%p274_p2), 0, %v596_v54 }
   0xd   : > { %v489_v43 = vld [vmem:[%s878_s4] sm:$0xf] (!%p274_p2) }
   0xe   : > { %468 = vperm.xlu0 (!%p274_p2), %732, %v460_v5   ;;  %482 = vperm.xlu1 (!%p274_p2), %733, %v474_v6  }
   0xf   : > { %s884_s9 = smov (!%p314_p3, %s659_s9), 37  ;;  %s886_s30 = smov (!%p323_p4, %s814_s30), 2 }
  0x10   : > { %s660_s17 = sshll.u32 %s884_s9, 2  ;;  %s325_s10 = scalar_lea.vmem %s882_s8, %s886_s30 }
  0x11   : > { %s834_s20 = scalar_lea.vmem %s874_s0, %s660_s17 }
  0x12   : > { %v734_v8 = vld [vmem:[%s834_s20] sm:$0xff]   ;;  %v735_v11 = vld [vmem:[%s834_s20 + $0x8] sm:$0xff]   ;;  %493 = vperm.xlu0 %732, %v490_v7   ;;  %577 = vperm.xlu1 %733, %v574_v9   ;;  %v736_v14 = vld [vmem:[%s834_s20 + $0x10] sm:$0xff]  }
  0x13   : > { %v395_v10 = vsel %vm390_vm1, %v734_v8, 0  ;;  %v398_v13 = vsel %vm390_vm1, %v735_v11, 0  ;;  %v401_v15 = vsel %vm390_vm1, %v736_v14, 0  ;;  %v737_v16 = vld [vmem:[%s834_s20 + $0x18] sm:$0xff]   ;;  %v738_v18 = vld [vmem:[%s834_s20 + $0x20] sm:$0xff]   ;;  %v739_v20 = vld [vmem:[%s834_s20 + $0x28] sm:$0xff]  }
  0x14   : > { %689 = vmatpush3.bf16.xpose.msra.mxu0 %v395_v10  ;;  %v404_v17 = vsel %vm390_vm1, %v737_v16, 0  ;;  %v407_v19 = vsel %vm390_vm1, %v738_v18, 0  ;;  %v410_v21 = vsel %vm390_vm1, %v739_v20, 0  ;;  %v740_v22 = vld [vmem:[%s834_s20 + $0x30] sm:$0xff]   ;;  %v741_v24 = vld [vmem:[%s834_s20 + $0x38] sm:$0xff]  }
  0x15   : > { %690 = vmatprep.subr.bf16.mxu0 %v755_v1  ;;  %v413_v23 = vsel %vm390_vm1, %v740_v22, 0  ;;  %v416_v25 = vsel %vm390_vm1, %v741_v24, 0 }
  0x16   : > { %592 = vperm.xlu0 %732, %v589_v12  }
  0x1c   : > { %691 = vmatpush3.bf16.xpose.msra.mxu0 %v398_v13 }
  0x1d   : > { %692 = vmatprep.subr.bf16.mxu0 %v755_v1 }
  0x24   : > { %693 = vmatpush3.bf16.xpose.msra.mxu0 %v401_v15 }
  0x25   : > { %694 = vmatprep.subr.bf16.mxu0 %v755_v1 }
  0x2c   : > { %695 = vmatpush3.bf16.xpose.msra.mxu0 %v404_v17 }
  0x2d   : > { %696 = vmatprep.subr.bf16.mxu0 %v755_v1 }
  0x34   : > { %697 = vmatpush3.bf16.xpose.msra.mxu0 %v407_v19 }
  0x35   : > { %698 = vmatprep.subr.bf16.mxu0 %v755_v1 }
  0x3c   : > { %699 = vmatpush3.bf16.xpose.msra.mxu0 %v410_v21 }
  0x3d   : > { %700 = vmatprep.subr.bf16.mxu0 %v755_v1 }
  0x44   : > { %701 = vmatpush3.bf16.xpose.msra.mxu0 %v413_v23 }
  0x45   : > { %702 = vmatprep.subr.bf16.mxu0 %v755_v1 }
  0x4c   : > { %703 = vmatpush3.bf16.xpose.msra.mxu0 %v416_v25 }
  0x53   : > { %705 = vmatmul.mubr.msk.bf16.vlgmr.msra.gmra.mrb[0].mxu0 %vm390_vm1, %v742_v26 }
  0x89   : > { %v464_v28 = vpop.permute.xlu0 %463  ;;  %v478_v29 = vpop.permute.xlu1 %477 }
  0x8d   : > { %v469_v33 = vpop.permute.xlu0 %468  ;;  %v483_v38 = vpop.permute.xlu1 %482 }
  0x91   : > { %v494_v44 = vpop.permute.xlu0 %493  ;;  %v578_v49 = vpop.permute.xlu1 %577 }
  0x95   : > { %v593_v59 = vpop.permute.xlu0 %592 }
  0x96   : > { %v598_v61 = vrot.slane %v593_v59, %v597_v57 }
 0x126   : > { %v452_v30 = vpop.f32.mrb[0].mxu0 }
 0x127   : > { %v471_v31 = vmul.f32 %v464_v28, %v452_v30  ;;  %v706_v32 = vpop.f32.mrb[1].mxu0 }
 0x128   : > { %v455_v34 = vpop.f32.mrb[2].mxu0 }
 0x129   : > { %v485_v35 = vadd.f32 %v478_v29, %v471_v31  ;;  %v472_v36 = vmul.f32 %v469_v33, %v455_v34  ;;  %v707_v37 = vpop.f32.mrb[3].mxu0 }
 0x12b   : > { %v486_v39 = vadd.f32 %v483_v38, %v472_v36  ;;  %v487_v40 = vmax.f32 %v485_v35, 0.0 }
 0x12d   : > { %v488_v41 = vmax.f32 %v486_v39, 0.0 }
 0x12f   : > { %v716_v42 = vpack.c.bf16 %v488_v41, %v487_v40 }
 0x131   : > { %718 = vmatpush3.bf16.msk.msra.mxu1 %vm717_vm4, %v716_v42 }
 0x134   : > { %713 = vmatmul.mubr.msk.f32.vlgmr.msra.gmra.mrb[0].mxu1 %vm390_vm1, %v489_v43 }
 0x207   : > { %v569_v45 = vpop.f32.mrb[0].mxu1 }
 0x208   : > { %v570_v46 = vadd.f32 %v569_v45, %v494_v44  ;;  %v714_v47 = vpop.f32.mrb[1].mxu1 }
 0x20a   : > { %v573_v48 = vmax.f32 %v570_v46, 0.0 }
 0x20c   : > { %v580_v50 = vmul.f32 %v578_v49, %v573_v48 }
 0x20e   : > { %v582_v52 = vsel %vm581_vm5, %v580_v50, 0.0 }
 0x20f   : > { %v583_v53 = vrot.slane %v582_v52, 4 }
 0x211   : > { %v584_v55 = vadd.f32 %v583_v53, %v582_v52 }
 0x213   : > { %v585_v56 = vrot.slane %v584_v55, 2 }
 0x215   : > { %v586_v58 = vadd.f32 %v585_v56, %v584_v55 }
 0x217   : > { %v587_v60 = vrot.slane %v586_v58, 1 }
 0x219   : > { %v588_v62 = vadd.f32 %v587_v60, %v586_v58 }
 0x21b   : > { %v599_v63 = vadd.f32 %v598_v61, %v588_v62 }
 0x21d   : > { %v673_v0 = vmul.f32 -1.442695, %v599_v63 }
 0x21f   : > { %743 = vpow2.f32 %v673_v0 }
 0x229   : > { %v744_v1 = vpop.eup %743 }
 0x22a   : > { %v603_v2 = vadd.f32 1.0, %v744_v1 }
 0x22c   : > { %745 = vrcp.f32 %v603_v2 }
 0x236   : > { %v746_v3 = vpop.eup %745 }
 0x237   : > { %606 = vst [vmem:[%s325_s10] sm:$0x1] %v746_v3 }
 0x238 PF: > { %s20_s29 = sadd.s32 1, %s753_s29  }
 0x239   : > { %p17_p5 = scmp.ge.s32.totalorder %s20_s29, 5  }
 0x23b   :  { %19 = sbr.rel (!%p17_p5) target bundleno = 3 (0x3), region = 82 }

</bundles_post_ra>
